<compile_context>
chip_gen: v6e
topology: v6e:2x2x1
jax: 0.10.0
libtpu: 0.0.40
codegen_flags: <defaults>
</compile_context>

<pallas_src>
import jax
import jax.numpy as jnp
from jax import lax
from jax.experimental import pallas as pl
from jax.experimental.pallas import tpu as pltpu

_HIDDEN = 25        # nn.Linear(in_features, 25)
_H_PAD = 128        # hidden padded to a full 128-lane vreg (zero pad is exact)
_LEAKY_SLOPE = 0.2


def _round_up(x, m):
    return (x + m - 1) // m * m


def _disc_kernel(x_ref, w1_ref, b1_ref, w2_ref, o_ref):
    """One batch tile of the fused Discriminator forward.

    x_ref : (TILE_B, F)     input rows (batch on sublanes, features on lanes)
    w1_ref: (H_PAD, F)      Linear1 weight, PyTorch (out, in) layout, zero-padded
    b1_ref: (H_PAD, 1)      Linear1 bias column (padded slot _HIDDEN holds 1.0)
    w2_ref: (H_PAD, 1)      Linear2 weight column (padded slot _HIDDEN holds b2)
    o_ref : (1, 1, TILE_B)  sigmoid output, batch on the lane axis (lane-dense)
    """
    x = x_ref[...]                                         # already f32

    # Linear(in_features, 25), transposed: h^T = W1 @ x^T  -> (H_PAD, TILE_B)
    # NT matmul (contract the last dim of both operands) keeps batch on lanes.
    h = lax.dot_general(
        w1_ref[...], x,
        dimension_numbers=(((1,), (1,)), ((), ())),
        preferred_element_type=jnp.float32,
    )

    # Bias + LeakyReLU(0.2); b1 column broadcasts along lanes (VPU).
    h = h + b1_ref[...]
    h = jnp.where(h > 0, h, _LEAKY_SLOPE * h)

    # Linear(25, 1) as VPU multiply + sublane (XLU) reduce — avoids an MXU
    # matmul with N=1. b2 arrives via the folded padding of (b1, w2).
    z = jnp.sum(h * w2_ref[...], axis=0, keepdims=True)    # (1, TILE_B)

    # Sigmoid: exp + approximate reciprocal both run on the EUP slot.
    out = pl.reciprocal(1.0 + jnp.exp(-z), approx=True)

    o_ref[...] = out.reshape(o_ref.shape).astype(o_ref.dtype)


def discriminator_forward(x, w1, b1, w2, b2, *, max_tile_b=512):
    """Fused Discriminator forward.

    Args:
      x : (B, in_features) float32
      w1: (25, in_features) float32   (PyTorch nn.Linear weight layout)
      b1: (25,)             float32
      w2: (1, 25)           float32
      b2: (1,)              float32
    Returns:
      (B, 1) float32 == Sigmoid(Linear(LeakyReLU(Linear(x))))
    """
    x = jnp.asarray(x, jnp.float32)
    B, F = x.shape
    H = w1.shape[0]
    assert H < _H_PAD, "need one spare padded hidden slot to fold b2 into"

    # --- pad params: hidden 25 -> 128, fold b2 into padded slot H -----------
    w1_p = jnp.zeros((_H_PAD, F), jnp.float32).at[:H, :].set(
        jnp.asarray(w1, jnp.float32))
    b1_p = jnp.zeros((_H_PAD, 1), jnp.float32).at[:H, 0].set(
        jnp.asarray(b1, jnp.float32))
    b1_p = b1_p.at[H, 0].set(1.0)
    w2_p = jnp.zeros((_H_PAD, 1), jnp.float32).at[:H, 0].set(
        jnp.asarray(w2, jnp.float32).reshape(-1))
    b2_scalar = jnp.reshape(jnp.asarray(b2, jnp.float32), ())
    w2_p = w2_p.at[H, 0].set(b2_scalar)

    # --- batch tiling: rows padded to a multiple of 8 sublanes, grid over tiles
    tile_b = min(max_tile_b, _round_up(B, 8))
    tile_b = _round_up(tile_b, 8)
    b_pad = _round_up(B, tile_b)
    n_tiles = b_pad // tile_b
    if b_pad != B:
        x = jnp.pad(x, ((0, b_pad - B), (0, 0)))

    cost = pl.CostEstimate(
        flops=int(2 * b_pad * F * _H_PAD + 4 * b_pad * _H_PAD),
        transcendentals=int(b_pad),
        bytes_accessed=int(x.size * 4 + w1_p.size * 4 + 2 * _H_PAD * 4 + b_pad * 4),
    )

    out = pl.pallas_call(
        _disc_kernel,
        out_shape=jax.ShapeDtypeStruct((n_tiles, 1, tile_b), jnp.float32),
        grid=(n_tiles,),
        in_specs=[
            pl.BlockSpec((tile_b, F), lambda i: (i, 0)),     # x: streamed per tile
            pl.BlockSpec((_H_PAD, F), lambda i: (0, 0)),     # w1: VMEM-resident
            pl.BlockSpec((_H_PAD, 1), lambda i: (0, 0)),     # b1: VMEM-resident
            pl.BlockSpec((_H_PAD, 1), lambda i: (0, 0)),     # w2 (+ folded b2)
        ],
        out_specs=pl.BlockSpec((1, 1, tile_b), lambda i: (i, 0, 0)),
        compiler_params=pltpu.CompilerParams(
            dimension_semantics=("parallel",),   # shard tiles over 2 TCs on v7x
        ),
        cost_estimate=cost,
    )(x, w1_p, b1_p, w2_p)

    return out.reshape(b_pad, 1)[:B]


def init_params(key, in_features, hidden=_HIDDEN, out_features=1):
    """Deterministic PyTorch-style (uniform +/- 1/sqrt(fan_in)) init."""
    k1, k2, k3, k4 = jax.random.split(key, 4)
    bound1 = 1.0 / jnp.sqrt(jnp.float32(in_features))
    bound2 = 1.0 / jnp.sqrt(jnp.float32(hidden))
    w1 = jax.random.uniform(k1, (hidden, in_features), jnp.float32, -bound1, bound1)
    b1 = jax.random.uniform(k2, (hidden,), jnp.float32, -bound1, bound1)
    w2 = jax.random.uniform(k3, (out_features, hidden), jnp.float32, -bound2, bound2)
    b2 = jax.random.uniform(k4, (out_features,), jnp.float32, -bound2, bound2)
    return w1, b1, w2, b2


def _reference(x, w1, b1, w2, b2):
    h = x @ w1.T + b1
    h = jnp.where(h > 0, h, _LEAKY_SLOPE * h)
    z = h @ w2.T + b2
    return jax.nn.sigmoid(z)


if __name__ == "__main__":
    key = jax.random.PRNGKey(0)
    k_x, k_p, k_x2 = jax.random.split(key, 3)

    in_features = 32
    w1, b1, w2, b2 = init_params(k_p, in_features)

    # Small single-tile case.
    x_small = jax.random.normal(k_x, (8, in_features), dtype=jnp.float32)
    out_small = jax.block_until_ready(discriminator_forward(x_small, w1, b1, w2, b2))
    ref_small = _reference(x_small, w1, b1, w2, b2)
    assert out_small.shape == (8, 1)
    assert jnp.allclose(out_small, ref_small, atol=5e-3), "mismatch (small batch)"

    # Multi-tile case with batch padding (exercises the pipelined grid path).
    x_big = jax.random.normal(k_x2, (300, in_features), dtype=jnp.float32)
    out_big = jax.block_until_ready(
        discriminator_forward(x_big, w1, b1, w2, b2, max_tile_b=128))
    ref_big = _reference(x_big, w1, b1, w2, b2)
    assert out_big.shape == (300, 1)
    assert jnp.allclose(out_big, ref_big, atol=5e-3), "mismatch (multi-tile batch)"

    print("KERNEL_OK")
</pallas_src>

<mosaic_0001>
module attributes {stable_mosaic.version = 11 : i64} {
  func.func @_disc_kernel(%arg0: i32, %arg1: memref<8x32xf32, #tpu.memory_space<vmem>>, %arg2: memref<128x32xf32, #tpu.memory_space<vmem>>, %arg3: memref<128x1xf32, #tpu.memory_space<vmem>>, %arg4: memref<128x1xf32, #tpu.memory_space<vmem>>, %arg5: memref<1x1x8xf32, #tpu.memory_space<vmem>>) attributes {dimension_semantics = [#tpu.dimension_semantics<parallel>], iteration_bounds = array<i64: 1>, scalar_prefetch = 0 : i64, scratch_operands = 0 : i64, tpu.core_type = #tpu.core_type<tc>, window_params = [{transform_indices = @transform_0, window_bounds = array<i64: 8, 32>}, {pipeline_mode = #tpu.pipeline_mode<synchronous>, transform_indices = @transform_1, window_bounds = array<i64: 128, 32>}, {pipeline_mode = #tpu.pipeline_mode<synchronous>, transform_indices = @transform_2, window_bounds = array<i64: 128, 1>}, {pipeline_mode = #tpu.pipeline_mode<synchronous>, transform_indices = @transform_3, window_bounds = array<i64: 128, 1>}, {transform_indices = @transform_4, window_bounds = array<i64: 1, 1, 8>}]} {
    %c0 = arith.constant 0 : index
    %c0_0 = arith.constant 0 : index
    %0 = vector.load %arg1[%c0, %c0_0] : memref<8x32xf32, #tpu.memory_space<vmem>>, vector<8x32xf32>
    %c0_1 = arith.constant 0 : index
    %c0_2 = arith.constant 0 : index
    %1 = vector.load %arg2[%c0_1, %c0_2] : memref<128x32xf32, #tpu.memory_space<vmem>>, vector<128x32xf32>
    %cst = arith.constant dense<0.000000e+00> : vector<128x8xf32>
    %2 = tpu.matmul %1, %0, %cst {dimension_numbers = #tpu.dot_dimension_numbers<[1], [1], [0], [0], [0, 0, 1, 0], [], []>} : vector<128x32xf32>, vector<8x32xf32>, vector<128x8xf32> -> vector<128x8xf32>
    %c0_3 = arith.constant 0 : index
    %c0_4 = arith.constant 0 : index
    %3 = vector.load %arg3[%c0_3, %c0_4] : memref<128x1xf32, #tpu.memory_space<vmem>>, vector<128x1xf32>
    %4 = vector.broadcast %3 : vector<128x1xf32> to vector<128x8xf32>
    %5 = arith.addf %2, %4 : vector<128x8xf32>
    %cst_5 = arith.constant 0.000000e+00 : f32
    %6 = vector.broadcast %cst_5 : f32 to vector<128x8xf32>
    %7 = arith.cmpf ogt, %5, %6 : vector<128x8xf32>
    %cst_6 = arith.constant 2.000000e-01 : f32
    %8 = vector.broadcast %cst_6 : f32 to vector<128x8xf32>
    %9 = arith.mulf %8, %5 : vector<128x8xf32>
    %10 = arith.select %7, %5, %9 : vector<128x8xi1>, vector<128x8xf32>
    %c0_7 = arith.constant 0 : index
    %c0_8 = arith.constant 0 : index
    %11 = vector.load %arg4[%c0_7, %c0_8] : memref<128x1xf32, #tpu.memory_space<vmem>>, vector<128x1xf32>
    %12 = vector.broadcast %11 : vector<128x1xf32> to vector<128x8xf32>
    %13 = arith.mulf %10, %12 : vector<128x8xf32>
    %cst_9 = arith.constant dense<0.000000e+00> : vector<8xf32>
    %14 = vector.multi_reduction <add>, %13, %cst_9 [0] : vector<128x8xf32> to vector<8xf32>
    %15 = vector.shape_cast %14 : vector<8xf32> to vector<1x8xf32>
    %cst_10 = arith.constant 0.000000e+00 : f32
    %16 = vector.broadcast %cst_10 : f32 to vector<1x8xf32>
    %17 = arith.subf %16, %15 : vector<1x8xf32>
    %18 = math.exp %17 : vector<1x8xf32>
    %cst_11 = arith.constant 1.000000e+00 : f32
    %19 = vector.broadcast %cst_11 : f32 to vector<1x8xf32>
    %20 = arith.addf %19, %18 : vector<1x8xf32>
    %21 = tpu.reciprocal %20 {approx = true} : vector<1x8xf32> -> vector<1x8xf32>
    %22 = vector.shape_cast %21 : vector<1x8xf32> to vector<1x1x8xf32>
    %c0_12 = arith.constant 0 : index
    %c0_13 = arith.constant 0 : index
    %c0_14 = arith.constant 0 : index
    %23 = vector.load %arg5[%c0_12, %c0_13, %c0_14] : memref<1x1x8xf32, #tpu.memory_space<vmem>>, vector<1x1x8xf32>
    tpu.vector_store %arg5[%c0_12, %c0_13, %c0_14], %22 {strides = array<i32>} : memref<1x1x8xf32, #tpu.memory_space<vmem>>, vector<1x1x8xf32>,
    return
  }
  func.func @transform_0(%arg0: i32) -> (i32, i32) {
    %c0_i32 = arith.constant 0 : i32
    %c0_i32_0 = arith.constant 0 : i32
    return %arg0, %c0_i32 : i32, i32
  }
  func.func @transform_1(%arg0: i32) -> (i32, i32) {
    %c0_i32 = arith.constant 0 : i32
    %c0_i32_0 = arith.constant 0 : i32
    %c0_i32_1 = arith.constant 0 : i32
    return %c0_i32, %c0_i32_0 : i32, i32
  }
  func.func @transform_2(%arg0: i32) -> (i32, i32) {
    %c0_i32 = arith.constant 0 : i32
    %c0_i32_0 = arith.constant 0 : i32
    %c0_i32_1 = arith.constant 0 : i32
    return %c0_i32, %c0_i32_0 : i32, i32
  }
  func.func @transform_3(%arg0: i32) -> (i32, i32) {
    %c0_i32 = arith.constant 0 : i32
    %c0_i32_0 = arith.constant 0 : i32
    %c0_i32_1 = arith.constant 0 : i32
    return %c0_i32, %c0_i32_0 : i32, i32
  }
  func.func @transform_4(%arg0: i32) -> (i32, i32, i32) {
    %c0_i32 = arith.constant 0 : i32
    %c0_i32_0 = arith.constant 0 : i32
    %c0_i32_1 = arith.constant 0 : i32
    return %arg0, %c0_i32, %c0_i32_0 : i32, i32, i32
  }
}

</mosaic_0001>

<bundles_post_ra>
// kernel: tpu_custom_call.1
= control target key start
LH: loop header
LB: loop body
LE: loop exit
PB: predicated region body
PF: predicated region fallthrough
CT: control target
= control target key end

     0   :  { %vm131_vm0 = vcmask 261120   ;;  %v639_v3 = vmov 0   ;;  %s880_s0 = inlined_call_operand.vmem [shape: f32[8,32], index: 0, kind: input, shape index: {}]   ;;  %s881_s1 = inlined_call_operand.vmem [shape: f32[128,32], index: 1, kind: input, shape index: {}]   ;;  %s882_s2 = inlined_call_operand.vmem [shape: f32[128,1], index: 2, kind: input, shape index: {}]   ;;  %s883_s3 = inlined_call_operand.vmem [shape: f32[128,1], index: 3, kind: input, shape index: {}]   ;;  %s884_s4 = inlined_call_operand.hbm [shape: f32[1,1,8], index: 4, kind: output, shape index: {}]  }
   0x1   :  { %v18_v0 = vld [vmem:[%s880_s0] sm:$0xff]  ;;  %v37_v1 = vld [vmem:[%s882_s2 + $0x10] sm:$0xff]  ;;  %612 = vset.pattern.permute.xlu1 %v639_v3  ;;  %611 = vset.pattern.permute.xlu0 %v639_v3  ;;  %v20_v6 = vld [vmem:[%s881_s1 + $0x8] sm:$0xff] }
   0x2   :  { %v35_v2 = vld [vmem:[%s882_s2] sm:$0xff]  ;;  %581 = vmatprep.subr.msk.mxu0 %vm131_vm0, %v18_v0  ;;  %607 = vmatprep.subr.msk.mxu1 %vm131_vm0, %v18_v0  ;;  %v28_v7 = vld [vmem:[%s881_s1 + $0x48] sm:$0xff]  ;;  %v38_v8 = vld [vmem:[%s882_s2 + $0x18] sm:$0xff] }
   0x3   :  { %v19_v4 = vld [vmem:[%s881_s1] sm:$0xff]  ;;  %63 = vperm.xlu1 %612, %v37_v1   ;;  %53 = vperm.xlu0 %611, %v35_v2   ;;  %v36_v9 = vld [vmem:[%s882_s2 + $0x8] sm:$0xff]  ;;  %v21_v10 = vld [vmem:[%s881_s1 + $0x10] sm:$0xff] }
   0x4   :  { %v27_v5 = vld [vmem:[%s881_s1 + $0x40] sm:$0xff]  ;;  %582 = vmatpush3.xpose.msk.msra.mxu0 %vm131_vm0, %v18_v0  ;;  %608 = vmatpush3.xpose.msk.msra.mxu1 %vm131_vm0, %v18_v0  ;;  %v29_v11 = vld [vmem:[%s881_s1 + $0x50] sm:$0xff]  ;;  %v22_v12 = vld [vmem:[%s881_s1 + $0x18] sm:$0xff] }
   0x5   :  { %583 = vmatprep.mubr.msk.f32.mxu0 %vm131_vm0, %v19_v4  ;;  %595 = vmatprep.mubr.msk.f32.mxu1 %vm131_vm0, %v27_v5  ;;  %v30_v13 = vld [vmem:[%s881_s1 + $0x58] sm:$0xff]  ;;  %v377_v14 = vld [vmem:[%s883_s3 + $0x8] sm:$0xff]  ;;  %v376_v15 = vld [vmem:[%s883_s3] sm:$0xff] }
   0x6   :  { %v23_v16 = vld [vmem:[%s881_s1 + $0x20] sm:$0xff]  ;;  %v24_v18 = vld [vmem:[%s881_s1 + $0x28] sm:$0xff]  ;;  %v378_v20 = vld [vmem:[%s883_s3 + $0x10] sm:$0xff] }
   0x7   :  { %584 = vmatmul.mubr.msk.f32.vlgmr.msra.gmra.mxu0 %vm131_vm0, %v20_v6  ;;  %596 = vmatmul.mubr.msk.f32.vlgmr.msra.gmra.mxu1 %vm131_vm0, %v28_v7  ;;  %v31_v17 = vld [vmem:[%s881_s1 + $0x60] sm:$0xff]  ;;  %v32_v19 = vld [vmem:[%s881_s1 + $0x68] sm:$0xff]  ;;  %v25_v22 = vld [vmem:[%s881_s1 + $0x30] sm:$0xff] }
   0x8   :  { %68 = vperm.xlu1 %612, %v38_v8   ;;  %58 = vperm.xlu0 %611, %v36_v9   ;;  %v39_v21 = vld [vmem:[%s882_s2 + $0x20] sm:$0xff]  ;;  %v33_v23 = vld [vmem:[%s881_s1 + $0x70] sm:$0xff]  ;;  %v26_v24 = vld [vmem:[%s881_s1 + $0x38] sm:$0xff] }
   0x9   :  { %586 = vmatprep.mubr.msk.f32.mxu0 %vm131_vm0, %v21_v10  ;;  %598 = vmatprep.mubr.msk.f32.mxu1 %vm131_vm0, %v29_v11  ;;  %v34_v25 = vld [vmem:[%s881_s1 + $0x78] sm:$0xff] }
   0xb   :  { %587 = vmatmul.mubr.msk.f32.gmra.mxu0 %vm131_vm0, %v22_v12  ;;  %599 = vmatmul.mubr.msk.f32.gmra.mxu1 %vm131_vm0, %v30_v13 }
   0xc   :  { %399 = vperm.xlu1 %612, %v377_v14   ;;  %394 = vperm.xlu0 %611, %v376_v15  }
   0xd   :  { %589 = vmatprep.mubr.msk.f32.mxu0 %vm131_vm0, %v23_v16  ;;  %601 = vmatprep.mubr.msk.f32.mxu1 %vm131_vm0, %v31_v17 }
   0xf   :  { %590 = vmatmul.mubr.msk.f32.gmra.mxu0 %vm131_vm0, %v24_v18  ;;  %602 = vmatmul.mubr.msk.f32.gmra.mxu1 %vm131_vm0, %v32_v19 }
  0x10   :  { %404 = vperm.xlu1 %612, %v378_v20   ;;  %73 = vperm.xlu0 %611, %v39_v21  }
  0x11   :  { %9 = vsyncpa [#allocation3], 0  ;;  %592 = vmatprep.mubr.msk.f32.mxu0 %vm131_vm0, %v25_v22  ;;  %604 = vmatprep.mubr.msk.f32.mxu1 %vm131_vm0, %v33_v23  ;;  %v379_v26 = vld [vmem:[%s883_s3 + $0x18] sm:$0xff]  ;;  %v40_v27 = vld [vmem:[%s882_s2 + $0x28] sm:$0xff]  ;;  %vm488_vm4 = vcmask 64512  }
  0x12   :  { %v380_v28 = vld [vmem:[%s883_s3 + $0x20] sm:$0xff]  ;;  %v41_v29 = vld [vmem:[%s882_s2 + $0x30] sm:$0xff]  ;;  %v381_v30 = vld [vmem:[%s883_s3 + $0x28] sm:$0xff] }
  0x13   :  { %593 = vmatmul.mubr.msk.f32.gmra.mxu0 %vm131_vm0, %v26_v24  ;;  %605 = vmatmul.mubr.msk.f32.gmra.mxu1 %vm131_vm0, %v34_v25  ;;  %v42_v31 = vld [vmem:[%s882_s2 + $0x38] sm:$0xff]  ;;  %v382_v32 = vld [vmem:[%s883_s3 + $0x30] sm:$0xff]  ;;  %v43_v33 = vld [vmem:[%s882_s2 + $0x40] sm:$0xff] }
  0x14   :  { %409 = vperm.xlu1 %612, %v379_v26   ;;  %78 = vperm.xlu0 %611, %v40_v27   ;;  %v383_v34 = vld [vmem:[%s883_s3 + $0x38] sm:$0xff]  ;;  %v44_v35 = vld [vmem:[%s882_s2 + $0x48] sm:$0xff]  ;;  %v384_v36 = vld [vmem:[%s883_s3 + $0x40] sm:$0xff] }
  0x15   :  { %v45_v37 = vld [vmem:[%s882_s2 + $0x50] sm:$0xff]  ;;  %v385_v38 = vld [vmem:[%s883_s3 + $0x48] sm:$0xff]  ;;  %v46_v39 = vld [vmem:[%s882_s2 + $0x58] sm:$0xff] }
  0x16   :  { %v386_v40 = vld [vmem:[%s883_s3 + $0x50] sm:$0xff]  ;;  %v47_v41 = vld [vmem:[%s882_s2 + $0x60] sm:$0xff]  ;;  %v387_v42 = vld [vmem:[%s883_s3 + $0x58] sm:$0xff] }
  0x17   :  { %v48_v43 = vld [vmem:[%s882_s2 + $0x68] sm:$0xff]  ;;  %v388_v44 = vld [vmem:[%s883_s3 + $0x60] sm:$0xff]  ;;  %v49_v45 = vld [vmem:[%s882_s2 + $0x70] sm:$0xff] }
  0x18   :  { %414 = vperm.xlu1 %612, %v380_v28   ;;  %83 = vperm.xlu0 %611, %v41_v29   ;;  %v389_v46 = vld [vmem:[%s883_s3 + $0x68] sm:$0xff]  ;;  %v50_v47 = vld [vmem:[%s882_s2 + $0x78] sm:$0xff]  ;;  %v390_v49 = vld [vmem:[%s883_s3 + $0x70] sm:$0xff]  ;;  %s640_s2 = smov [#allocation2]  }
  0x19   :  { %v391_v48 = vld [vmem:[%s883_s3 + $0x78] sm:$0xff]  ;;  %s539_s3 = sshll.u32 %s640_s2, 4  ;;  %s540_s3 = int_to_ptr.vmem [resolvable:$true] %s539_s3 }
  0x1a   :  { %s617_s29 = scalar_lea.vmem %s540_s3, 16  ;;  %s621_s30 = scalar_lea.vmem %s540_s3, 32 }
  0x1b   :  { %p618_p0 = scmp.ne.s32.totalorder %s540_s3, %s617_s29  ;;  %p622_p1 = scmp.lt.s32.totalorder %s540_s3, %s540_s3 }
  0x1c   :  { %419 = vperm.xlu1 %612, %v381_v30   ;;  %88 = vperm.xlu0 %611, %v42_v31   ;;  %p623_p2 = scmp.lt.s32.totalorder %s621_s30, %s617_s29 }
  0x1e   :  { %p624_p3 = por %p623_p2, %p622_p1 }
  0x20   :  { %424 = vperm.xlu1 %612, %v382_v32   ;;  %93 = vperm.xlu0 %611, %v43_v33   ;;  %p625_p4 = pnand %p624_p3, %p618_p0 }
  0x24   :  { %429 = vperm.xlu1 %612, %v383_v34   ;;  %98 = vperm.xlu0 %611, %v44_v35  }
  0x28   :  { %434 = vperm.xlu1 %612, %v384_v36   ;;  %103 = vperm.xlu0 %611, %v45_v37  }
  0x2c   :  { %439 = vperm.xlu1 %612, %v385_v38   ;;  %108 = vperm.xlu0 %611, %v46_v39  }
  0x30   :  { %444 = vperm.xlu1 %612, %v386_v40   ;;  %113 = vperm.xlu0 %611, %v47_v41  }
  0x34   :  { %449 = vperm.xlu1 %612, %v387_v42   ;;  %118 = vperm.xlu0 %611, %v48_v43  }
  0x38   :  { %454 = vperm.xlu1 %612, %v388_v44   ;;  %123 = vperm.xlu0 %611, %v49_v45  }
  0x3c   :  { %459 = vperm.xlu1 %612, %v389_v46   ;;  %128 = vperm.xlu0 %611, %v50_v47  }
  0x40   :  { %469 = vperm.xlu1 %612, %v391_v48   ;;  %464 = vperm.xlu0 %611, %v390_v49  }
  0x7e   :  { %v54_v50 = vpop.permute.xlu0 %53  ;;  %v64_v51 = vpop.permute.xlu1 %63 }
  0x83   :  { %v59_v52 = vpop.permute.xlu0 %58  ;;  %v69_v53 = vpop.permute.xlu1 %68 }
  0x87   :  { %v395_v54 = vpop.permute.xlu0 %394  ;;  %v400_v55 = vpop.permute.xlu1 %399 }
  0x8b   :  { %v74_v56 = vpop.permute.xlu0 %73  ;;  %v405_v57 = vpop.permute.xlu1 %404 }
  0x8f   :  { %v79_v58 = vpop.permute.xlu0 %78  ;;  %v410_v59 = vpop.permute.xlu1 %409 }
  0x93   :  { %v833_v60 = vpop.permute.xlu0 %83  ;;  %v835_v61 = vpop.permute.xlu1 %414 }
  0x97   :  { %v837_v62 = vpop.permute.xlu0 %88  ;;  %v839_v63 = vpop.permute.xlu1 %419 }
  0x9b   :  { %v94_v0 = vpop.permute.xlu0 %93  ;;  %v841_v1 = vpop.permute.xlu1 %424 }
  0x9f   :  { %v99_v2 = vpop.permute.xlu0 %98  ;;  %v843_v3 = vpop.permute.xlu1 %429 }
  0xa3   :  { %v845_v6 = vpop.permute.xlu0 %103  ;;  %v847_v14 = vpop.permute.xlu1 %434 }
  0xa7   :  { %v109_v17 = vpop.permute.xlu0 %108  ;;  %v849_v28 = vpop.permute.xlu1 %439 }
  0xab   :  { %v114_v30 = vpop.permute.xlu0 %113  ;;  %v445_v45 = vpop.permute.xlu1 %444 }
  0xaf   :  { %v119_v49 = vpop.permute.xlu0 %118 }
  0xc7   :  { %v585_v4 = vpop.f32.mrf.mxu0  ;;  %v597_v5 = vpop.f32.mrf.mxu1 }
  0xc8   :  { %v255_v7 = vadd.f32 %v585_v4, %v59_v52 }
  0xc9   :  { %v249_v8 = vpop.f32.mrf.mxu0  ;;  %v289_v9 = vpop.f32.mrf.mxu1 }
  0xca   :  { %v250_v10 = vadd.f32 %v249_v8, %v54_v50  ;;  %v345_v12 = vmul.f32 0.2, %v255_v7  ;;  %vm329_vm1 = vcmp.gt.f32.partialorder %v255_v7, 0.0  ;;  %v290_v40 = vadd.f32 %v289_v9, %v94_v0  ;;  %v450_v9 = vpop.permute.xlu1 %449 }
  0xcb   :  { %v588_v11 = vpop.f32.mrf.mxu0  ;;  %v600_v18 = vpop.f32.mrf.mxu1  ;;  %v295_v50 = vadd.f32 %v597_v5, %v99_v2 }
  0xcc   :  { %v265_v13 = vadd.f32 %v588_v11, %v69_v53  ;;  %vm328_vm2 = vcmp.gt.f32.partialorder %v250_v10, 0.0  ;;  %v344_v15 = vmul.f32 0.2, %v250_v10  ;;  %v361_v21 = vsel %vm329_vm1, %v255_v7, %v345_v12  ;;  %v124_v12 = vpop.permute.xlu0 %123 }
  0xcd   :  { %v259_v16 = vpop.f32.mrf.mxu0  ;;  %v299_v26 = vpop.f32.mrf.mxu1  ;;  %v473_v29 = vmul.f32 %v400_v55, %v361_v21  ;;  %vm336_vm8 = vcmp.gt.f32.partialorder %v290_v40, 0.0  ;;  %vm337_vm11 = vcmp.gt.f32.partialorder %v295_v50, 0.0 }
  0xce   :  { %v360_v19 = vsel %vm328_vm2, %v250_v10, %v344_v15  ;;  %v347_v22 = vmul.f32 0.2, %v265_v13  ;;  %vm331_vm3 = vcmp.gt.f32.partialorder %v265_v13, 0.0  ;;  %v260_v24 = vadd.f32 %v259_v16, %v64_v51 }
  0xcf   :  { %v591_v20 = vpop.f32.mrf.mxu0  ;;  %v472_v23 = vmul.f32 %v395_v54, %v360_v19  ;;  %v603_v37 = vpop.f32.mrf.mxu1  ;;  %v490_v39 = vsel %vm488_vm4, %v473_v29, 0.0  ;;  %v300_v4 = vadd.f32 %v299_v26, %v845_v6  ;;  %v353_v10 = vmul.f32 0.2, %v295_v50 }
  0xd0   :  { %v275_v27 = vadd.f32 %v591_v20, %v79_v58  ;;  %v363_v31 = vsel %vm331_vm3, %v265_v13, %v347_v22  ;;  %vm330_vm5 = vcmp.gt.f32.partialorder %v260_v24, 0.0  ;;  %v346_v32 = vmul.f32 0.2, %v260_v24 }
  0xd1   :  { %v269_v25 = vpop.f32.mrf.mxu0  ;;  %v489_v33 = vsel %vm488_vm4, %v472_v23, 0.0  ;;  %v475_v41 = vmul.f32 %v410_v59, %v363_v31  ;;  %v309_v53 = vpop.f32.mrf.mxu1  ;;  %v354_v13 = vmul.f32 0.2, %v300_v4  ;;  %vm338_vm12 = vcmp.gt.f32.partialorder %v300_v4, 0.0 }
  0xd2   :  { %v349_v34 = vmul.f32 0.2, %v275_v27  ;;  %v362_v36 = vsel %vm330_vm5, %v260_v24, %v346_v32  ;;  %vm333_vm6 = vcmp.gt.f32.partialorder %v275_v27, 0.0  ;;  %v270_v38 = vadd.f32 %v269_v25, %v74_v56  ;;  %v455_v25 = vpop.permute.xlu1 %454  ;;  %v129_v31 = vpop.permute.xlu0 %128 }
  0xd3   :  { %v594_v35 = vpop.f32.mrf.mxu0  ;;  %v474_v42 = vmul.f32 %v405_v57, %v362_v36  ;;  %v491_v43 = vadd.f32 %v490_v39, %v489_v33  ;;  %v494_v54 = vsel %vm488_vm4, %v475_v41, 0.0  ;;  %v352_v57 = vmul.f32 0.2, %v290_v40  ;;  %v606_v8 = vpop.f32.mrf.mxu1 }
  0xd4   :  { %vm332_vm7 = vcmp.gt.f32.partialorder %v270_v38, 0.0  ;;  %v348_v44 = vmul.f32 0.2, %v270_v38  ;;  %v365_v47 = vsel %vm333_vm6, %v275_v27, %v349_v34  ;;  %v285_v56 = vadd.f32 %v594_v35, %v837_v62 }
  0xd5   :  { %v492_v46 = vsel %vm488_vm4, %v474_v42, 0.0  ;;  %v279_v48 = vpop.f32.mrf.mxu0  ;;  %v477_v58 = vmul.f32 %v839_v63, %v365_v47  ;;  %v368_v63 = vsel %vm336_vm8, %v290_v40, %v352_v57  ;;  %v310_v6 = vadd.f32 %v309_v53, %v114_v30  ;;  %v319_v21 = vpop.f32.mrf.mxu1 }
  0xd6   :  { %v493_v51 = vadd.f32 %v492_v46, %v491_v43  ;;  %v364_v52 = vsel %vm332_vm7, %v270_v38, %v348_v44  ;;  %v280_v0 = vadd.f32 %v279_v48, %v833_v60  ;;  %vm335_vm9 = vcmp.gt.f32.partialorder %v285_v56, 0.0  ;;  %v460_v42 = vpop.permute.xlu1 %459 }
  0xd7   :  { %v476_v55 = vmul.f32 %v835_v61, %v364_v52  ;;  %v351_v5 = vmul.f32 0.2, %v285_v56  ;;  %v305_v61 = vadd.f32 %v600_v18, %v109_v17  ;;  %v498_v60 = vsel %vm488_vm4, %v477_v58, 0.0 }
  0xd8   :  { %v495_v59 = vadd.f32 %v494_v54, %v493_v51  ;;  %vm334_vm10 = vcmp.gt.f32.partialorder %v280_v0, 0.0  ;;  %v350_v62 = vmul.f32 0.2, %v280_v0  ;;  %v369_v22 = vsel %vm337_vm11, %v295_v50, %v353_v10  ;;  %v465_v51 = vpop.permute.xlu0 %464 }
  0xd9   :  { %v496_v2 = vsel %vm488_vm4, %v476_v55, 0.0  ;;  %v367_v11 = vsel %vm335_vm9, %v285_v56, %v351_v5  ;;  %v355_v17 = vmul.f32 0.2, %v305_v61  ;;  %v315_v18 = vadd.f32 %v603_v37, %v119_v49 }
  0xda   :  { %v497_v7 = vadd.f32 %v496_v2, %v495_v59  ;;  %v366_v15 = vsel %vm334_vm10, %v280_v0, %v350_v62  ;;  %v479_v19 = vmul.f32 %v843_v3, %v367_v11  ;;  %v480_v23 = vmul.f32 %v847_v14, %v368_v63  ;;  %v470_v56 = vpop.permute.xlu1 %469 }
  0xdb   :  { %v478_v20 = vmul.f32 %v841_v1, %v366_v15  ;;  %vm339_vm13 = vcmp.gt.f32.partialorder %v305_v61, 0.0  ;;  %v370_v26 = vsel %vm338_vm12, %v300_v4, %v354_v13  ;;  %v356_v27 = vmul.f32 0.2, %v310_v6 }
  0xdc   :  { %v499_v16 = vadd.f32 %v498_v60, %v497_v7  ;;  %v320_v30 = vadd.f32 %v319_v21, %v124_v12  ;;  %v481_v32 = vmul.f32 %v849_v28, %v369_v22  ;;  %vm340_vm14 = vcmp.gt.f32.partialorder %v310_v6, 0.0 }
  0xdd   :  { %v500_v24 = vsel %vm488_vm4, %v478_v20, 0.0  ;;  %v502_v1 = vsel %vm488_vm4, %v479_v19, 0.0  ;;  %v371_v3 = vsel %vm339_vm13, %v305_v61, %v355_v17  ;;  %v357_v33 = vmul.f32 0.2, %v315_v18 }
  0xde   :  { %v501_v29 = vadd.f32 %v500_v24, %v499_v16  ;;  %v325_v34 = vadd.f32 %v606_v8, %v129_v31  ;;  %v504_v14 = vsel %vm488_vm4, %v480_v23, 0.0  ;;  %v482_v36 = vmul.f32 %v445_v45, %v370_v26 }
  0xdf   :  { %vm341_vm15 = vcmp.gt.f32.partialorder %v315_v18, 0.0  ;;  %v372_v37 = vsel %vm340_vm14, %v310_v6, %v356_v27  ;;  %v358_v39 = vmul.f32 0.2, %v320_v30  ;;  %v506_v40 = vsel %vm488_vm4, %v481_v32, 0.0 }
  0xe0   :  { %v503_v35 = vadd.f32 %v502_v1, %v501_v29  ;;  %v483_v41 = vmul.f32 %v450_v9, %v371_v3  ;;  %vm342_vm0 = vcmp.gt.f32.partialorder %v320_v30, 0.0  ;;  %v373_v28 = vsel %vm341_vm15, %v315_v18, %v357_v33 }
  0xe1   :  { %v359_v43 = vmul.f32 0.2, %v325_v34  ;;  %v508_v46 = vsel %vm488_vm4, %v482_v36, 0.0  ;;  %v484_v47 = vmul.f32 %v455_v25, %v372_v37  ;;  %vm343_vm1 = vcmp.gt.f32.partialorder %v325_v34, 0.0 }
  0xe2   :  { %v505_v38 = vadd.f32 %v504_v14, %v503_v35  ;;  %v374_v48 = vsel %vm342_vm0, %v320_v30, %v358_v39  ;;  %v510_v45 = vsel %vm488_vm4, %v483_v41, 0.0  ;;  %v485_v50 = vmul.f32 %v460_v42, %v373_v28 }
  0xe3   :  { %v375_v52 = vsel %vm343_vm1, %v325_v34, %v359_v43  ;;  %v512_v54 = vsel %vm488_vm4, %v484_v47, 0.0  ;;  %v486_v55 = vmul.f32 %v465_v51, %v374_v48  ;;  %vm531_vm2 = vcmask 57344  }
  0xe4   :  { %v507_v44 = vadd.f32 %v506_v40, %v505_v38  ;;  %v514_v58 = vsel %vm488_vm4, %v485_v50, 0.0  ;;  %v487_v59 = vmul.f32 %v470_v56, %v375_v52 }
  0xe5   :  { %v516_v4 = vsel %vm488_vm4, %v486_v55, 0.0 }
  0xe6   :  { %v509_v49 = vadd.f32 %v508_v46, %v507_v44  ;;  %v518_v5 = vsel %vm488_vm4, %v487_v59, 0.0 }
  0xe8   :  { %v511_v53 = vadd.f32 %v510_v45, %v509_v49 }
  0xea   :  { %v513_v57 = vadd.f32 %v512_v54, %v511_v53 }
  0xec   :  { %v515_v0 = vadd.f32 %v514_v58, %v513_v57 }
  0xee   :  { %v517_v2 = vadd.f32 %v516_v4, %v515_v0 }
  0xf0   :  { %v519_v7 = vadd.f32 %v518_v5, %v517_v2 }
  0xf2   :  { %v520_v8 = vrot.slane %v519_v7, 4 }
  0xf4   :  { %v521_v9 = vadd.f32 %v520_v8, %v519_v7 }
  0xf6   :  { %v522_v10 = vrot.slane %v521_v9, 2 }
  0xf8   :  { %v523_v61 = vadd.f32 %v522_v10, %v521_v9 }
  0xfa   :  { %v524_v11 = vrot.slane %v523_v61, 1 }
  0xfc   :  { %v525_v62 = vadd.f32 %v524_v11, %v523_v61 }
  0xfe   :  { %v526_v12 = vsub.f32 0.0, %v525_v62 }
 0x100   :  { %v527_v63 = vmul.f32 1.442695, %v526_v12 }
 0x102   :  { %613 = vpow2.f32 %v527_v63 }
 0x10f   :  { %v614_v60 = vpop.eup %613 }
 0x110   :  { %v529_v13 = vadd.f32 1.0, %v614_v60 }
 0x112   :  { %615 = vrcp.f32 %v529_v13 }
 0x11f   :  { %v616_v6 = vpop.eup %615 }
 0x120   :  { %532 = vst.msk [vmem:[#allocation2] sm:$0x1] %vm531_vm2, %v616_v6 }
 0x121   :  { %628 = shalt.err (!%p625_p4)
}
 0x122   :  { %542 = dma.vmem_to_hbm [thread:$0]  %s540_s3, 16, %s884_s4, [#allocation3]  }
 0x123   :  { %637 = dma.done.wait [#allocation3], 16  }
 0x124   :  { %638 = vsyncadd [#allocation3], 4294967280 }
 0x125   :  { %546 = vsyncpa [#allocation3], 1 }

</bundles_post_ra>
